<compile_context>
chip_gen: v7x
topology: tpu7x:2x2x1
jax: 0.10.0
libtpu: 0.0.40
codegen_flags: <defaults>
</compile_context>

<pallas_src>
import jax
import jax.numpy as jnp
from jax.experimental import pallas as pl
from jax.experimental.pallas import tpu as pltpu


def _make_kernel(w: int, dropout_rate: float, training: bool,
                 use_inkernel_prng: bool):
    apply_dropout = training and dropout_rate > 0.0
    keep_scale = 1.0 / (1.0 - dropout_rate) if dropout_rate < 1.0 else 0.0
    # drop iff bits < thresh; exact for any p representable in 32 bits
    thresh = min(int(round(dropout_rate * (1 << 32))), (1 << 32) - 1)

    def _pool(x_ref, ee_ref, eo_ref):
        # x_ref block: (TILE_R, 2*W); lanes [0:W] = image row 2i, [W:2W] = 2i+1
        hmax = jnp.maximum(x_ref[:, :w], x_ref[:, w:])            # (TILE_R, W)
        # Deinterleave even/odd W-columns with 0/1 gather matrices on the MXU
        # (idle unit in this mem-bound kernel; exact: one 1.0 per column).
        even = jnp.dot(hmax, ee_ref[...], preferred_element_type=jnp.float32)
        odd = jnp.dot(hmax, eo_ref[...], preferred_element_type=jnp.float32)
        return jnp.maximum(even, odd)                             # (TILE_R, Wo)

    if not apply_dropout:
        def kernel(x_ref, ee_ref, eo_ref, o_ref):
            o_ref[...] = _pool(x_ref, ee_ref, eo_ref).astype(o_ref.dtype)
    elif use_inkernel_prng:
        def kernel(seed_ref, x_ref, ee_ref, eo_ref, o_ref):
            pooled = _pool(x_ref, ee_ref, eo_ref)
            # independent mask per grid block
            pltpu.prng_seed(seed_ref[0], pl.program_id(0))
            bits = pltpu.prng_random_bits(pooled.shape)
            if bits.dtype != jnp.uint32:
                bits = pltpu.bitcast(bits, jnp.uint32)
            keep = bits >= jnp.uint32(thresh)
            o_ref[...] = jnp.where(keep, pooled * keep_scale,
                                   0.0).astype(o_ref.dtype)
    else:
        def kernel(x_ref, bits_ref, ee_ref, eo_ref, o_ref):
            pooled = _pool(x_ref, ee_ref, eo_ref)
            keep = bits_ref[...] >= jnp.uint32(thresh)
            o_ref[...] = jnp.where(keep, pooled * keep_scale,
                                   0.0).astype(o_ref.dtype)

    return kernel


def pooling_block(x, *, dropout_rate: float = 0.25, training: bool = True,
                  seed: int = 0):
    """Forward pass of PoolingBlock (MaxPool2d(2,2) -> Dropout). x is NCHW."""
    N, C, H, W = x.shape
    assert H % 2 == 0 and W % 2 == 0, "MaxPool2d(2,2) needs even H, W here"
    assert 0.0 <= dropout_rate < 1.0
    Ho, Wo = H // 2, W // 2
    R = N * C * Ho                       # one row per 2-row pooling band

    # Free (layout-preserving) view: each row = two consecutive image rows.
    x2 = x.reshape(R, 2 * W)

    # Tiny 0/1 gather matrices selecting even / odd input columns.
    cols = jnp.arange(W, dtype=jnp.int32)[:, None]
    outs = jnp.arange(Wo, dtype=jnp.int32)[None, :]
    e_even = (cols == 2 * outs).astype(x.dtype)        # (W, Wo)
    e_odd = (cols == 2 * outs + 1).astype(x.dtype)     # (W, Wo)

    # Row tiling: biggest block that keeps the double-buffered input well
    # under the scoped-VMEM budget on every generation (v7x: 32 MiB scoped).
    bytes_per_row = 2 * W * x.dtype.itemsize
    if R <= 8:
        tile_r = R
    else:
        tile_r = min(R, 1024, max(8, (4 * 1024 * 1024) // bytes_per_row))
        tile_r -= tile_r % 8
    grid = (pl.cdiv(R, tile_r),)

    apply_dropout = training and dropout_rate > 0.0
    use_inkernel_prng = apply_dropout and jax.default_backend() == "tpu"

    kernel = _make_kernel(W, float(dropout_rate), bool(training),
                          use_inkernel_prng)

    x_spec = pl.BlockSpec((tile_r, 2 * W), lambda i, *_: (i, 0))
    gather_spec = pl.BlockSpec((W, Wo), lambda i, *_: (0, 0))
    out_spec = pl.BlockSpec((tile_r, Wo), lambda i, *_: (i, 0))
    out_shape = jax.ShapeDtypeStruct((R, Wo), x.dtype)
    cparams = pltpu.CompilerParams(dimension_semantics=("parallel",))

    if not apply_dropout:
        y = pl.pallas_call(
            kernel, out_shape=out_shape,
            grid_spec=pltpu.PrefetchScalarGridSpec(
                num_scalar_prefetch=0, grid=grid,
                in_specs=[x_spec, gather_spec, gather_spec],
                out_specs=out_spec),
            compiler_params=cparams,
        )(x2, e_even, e_odd)
    elif use_inkernel_prng:
        seed_arr = jnp.asarray([seed], dtype=jnp.int32)
        y = pl.pallas_call(
            kernel, out_shape=out_shape,
            grid_spec=pltpu.PrefetchScalarGridSpec(
                num_scalar_prefetch=1, grid=grid,       # seed lands in SMEM
                in_specs=[x_spec, gather_spec, gather_spec],
                out_specs=out_spec),
            compiler_params=cparams,
        )(seed_arr, x2, e_even, e_odd)
    else:
        # Non-TPU backend (e.g. interpret mode): pltpu.prng_* has no lowering
        # there, so stream precomputed random bits in as a normal operand.
        bits = jax.random.bits(jax.random.PRNGKey(seed), (R, Wo),
                               dtype=jnp.uint32)
        bits_spec = pl.BlockSpec((tile_r, Wo), lambda i, *_: (i, 0))
        y = pl.pallas_call(
            kernel, out_shape=out_shape,
            grid_spec=pltpu.PrefetchScalarGridSpec(
                num_scalar_prefetch=0, grid=grid,
                in_specs=[x_spec, bits_spec, gather_spec, gather_spec],
                out_specs=out_spec),
            compiler_params=cparams,
        )(x2, bits, e_even, e_odd)

    return y.reshape(N, C, Ho, Wo)


if __name__ == "__main__":
    key = jax.random.PRNGKey(0)
    x = jax.random.normal(key, (2, 4, 16, 16), dtype=jnp.float32)

    # eval mode: dropout is identity -> must match a pure-JAX 2x2 max-pool
    y_eval = jax.block_until_ready(
        pooling_block(x, dropout_rate=0.25, training=False))
    ref = jnp.max(x.reshape(2, 4, 8, 2, 8, 2), axis=(3, 5))
    assert y_eval.shape == (2, 4, 8, 8)
    assert jnp.allclose(y_eval, ref), "maxpool mismatch vs reference"

    # training mode: every output is either 0 (dropped) or pooled/(1-p) (kept)
    y_train = jax.block_until_ready(
        pooling_block(x, dropout_rate=0.25, training=True, seed=0))
    assert y_train.shape == (2, 4, 8, 8)
    scaled = ref / 0.75
    ok = (jnp.isclose(y_train, 0.0, atol=1e-6)
          | jnp.isclose(y_train, scaled, rtol=1e-5, atol=1e-6))
    assert bool(jnp.all(ok)), "dropout output not in {0, pooled/(1-p)}"

    print("KERNEL_OK")
</pallas_src>

<mosaic_0001>
module attributes {stable_mosaic.version = 11 : i64} {
  func.func @kernel(%arg0: i32, %arg1: memref<64x32xf32, #tpu.memory_space<vmem>>, %arg2: memref<16x8xf32, #tpu.memory_space<vmem>>, %arg3: memref<16x8xf32, #tpu.memory_space<vmem>>, %arg4: memref<64x8xf32, #tpu.memory_space<vmem>>) attributes {dimension_semantics = [#tpu.dimension_semantics<parallel>], iteration_bounds = array<i64: 1>, scalar_prefetch = 0 : i64, scratch_operands = 0 : i64, tpu.core_type = #tpu.core_type<tc>, window_params = [{transform_indices = @transform_0, window_bounds = array<i64: 64, 32>}, {pipeline_mode = #tpu.pipeline_mode<synchronous>, transform_indices = @transform_1, window_bounds = array<i64: 16, 8>}, {pipeline_mode = #tpu.pipeline_mode<synchronous>, transform_indices = @transform_2, window_bounds = array<i64: 16, 8>}, {transform_indices = @transform_3, window_bounds = array<i64: 64, 8>}]} {
    %c0 = arith.constant 0 : index
    %c0_0 = arith.constant 0 : index
    %0 = vector.load %arg1[%c0, %c0_0] : memref<64x32xf32, #tpu.memory_space<vmem>>, vector<64x16xf32>
    %c0_1 = arith.constant 0 : index
    %c16 = arith.constant 16 : index
    %1 = vector.load %arg1[%c0_1, %c16] : memref<64x32xf32, #tpu.memory_space<vmem>>, vector<64x16xf32>
    %2 = arith.maximumf %0, %1 : vector<64x16xf32>
    %c0_2 = arith.constant 0 : index
    %c0_3 = arith.constant 0 : index
    %3 = vector.load %arg2[%c0_2, %c0_3] : memref<16x8xf32, #tpu.memory_space<vmem>>, vector<16x8xf32>
    %cst = arith.constant dense<0.000000e+00> : vector<64x8xf32>
    %4 = tpu.matmul %2, %3, %cst {dimension_numbers = #tpu.dot_dimension_numbers<[1], [0], [0], [1], [0, 0, 1, 1], [], []>} : vector<64x16xf32>, vector<16x8xf32>, vector<64x8xf32> -> vector<64x8xf32>
    %c0_4 = arith.constant 0 : index
    %c0_5 = arith.constant 0 : index
    %5 = vector.load %arg3[%c0_4, %c0_5] : memref<16x8xf32, #tpu.memory_space<vmem>>, vector<16x8xf32>
    %cst_6 = arith.constant dense<0.000000e+00> : vector<64x8xf32>
    %6 = tpu.matmul %2, %5, %cst_6 {dimension_numbers = #tpu.dot_dimension_numbers<[1], [0], [0], [1], [0, 0, 1, 1], [], []>} : vector<64x16xf32>, vector<16x8xf32>, vector<64x8xf32> -> vector<64x8xf32>
    %7 = arith.maximumf %4, %6 : vector<64x8xf32>
    %c0_7 = arith.constant 0 : index
    %c0_8 = arith.constant 0 : index
    %8 = vector.load %arg4[%c0_7, %c0_8] : memref<64x8xf32, #tpu.memory_space<vmem>>, vector<64x8xf32>
    tpu.vector_store %arg4[%c0_7, %c0_8], %7 {strides = array<i32>} : memref<64x8xf32, #tpu.memory_space<vmem>>, vector<64x8xf32>,
    return
  }
  func.func @transform_0(%arg0: i32) -> (i32, i32) {
    %c0_i32 = arith.constant 0 : i32
    %c0_i32_0 = arith.constant 0 : i32
    return %arg0, %c0_i32 : i32, i32
  }
  func.func @transform_1(%arg0: i32) -> (i32, i32) {
    %c0_i32 = arith.constant 0 : i32
    %c0_i32_0 = arith.constant 0 : i32
    %c0_i32_1 = arith.constant 0 : i32
    return %c0_i32, %c0_i32_0 : i32, i32
  }
  func.func @transform_2(%arg0: i32) -> (i32, i32) {
    %c0_i32 = arith.constant 0 : i32
    %c0_i32_0 = arith.constant 0 : i32
    %c0_i32_1 = arith.constant 0 : i32
    return %c0_i32, %c0_i32_0 : i32, i32
  }
  func.func @transform_3(%arg0: i32) -> (i32, i32) {
    %c0_i32 = arith.constant 0 : i32
    %c0_i32_0 = arith.constant 0 : i32
    return %arg0, %c0_i32 : i32, i32
  }
}

</mosaic_0001>

<bundles_post_ra>
// kernel: tpu_custom_call.1
= control target key start
LH: loop header
LB: loop body
LE: loop exit
PB: predicated region body
PF: predicated region fallthrough
CT: control target
= control target key end

     0   :  { %s399_s16 = smov 112   ;;  %vm64_vm0 = vcmask 130048   ;;  %vm309_vm1 = vcmask 64512   ;;  %s504_s0 = inlined_call_operand.vmem [shape: f32[64,32], index: 0, kind: input, shape index: {}]   ;;  %s505_s1 = inlined_call_operand.vmem [shape: f32[16,8], index: 1, kind: input, shape index: {}]   ;;  %s506_s2 = inlined_call_operand.vmem [shape: f32[16,8], index: 2, kind: input, shape index: {}]   ;;  %s507_s3 = inlined_call_operand.vmem [shape: f32[64,8], index: 3, kind: output, shape index: {}]  }
   0x1   :  { %v14_v0 = vld [vmem:[%s504_s0] sm:$0xff]  ;;  %v16_v1 = vld [vmem:[%s504_s0 + $0x10] sm:$0xff]  ;;  %v15_v2 = vld [vmem:[%s504_s0 + $0x8] sm:$0xff] }
   0x2   :  { %30 = vrot.lane.b32.xlu0 %v14_v0, %s399_s16  ;;  %34 = vrot.lane.b32.xlu1 %v16_v1, %s399_s16  ;;  %v17_v3 = vld [vmem:[%s504_s0 + $0x18] sm:$0xff]  ;;  %v62_v4 = vld [vmem:[%s505_s1] sm:$0xff] }
   0x3   :  { %v63_v5 = vld [vmem:[%s505_s1 + $0x8] sm:$0xff]  ;;  %v194_v6 = vld [vmem:[%s506_s2] sm:$0xff]  ;;  %v20_v12 = vld [vmem:[%s504_s0 + $0x30] sm:$0xff] }
   0x4   :  { %v390_v7 = vpack.c.bf16 %v63_v5, %v62_v4  ;;  %v195_v8 = vld [vmem:[%s506_s2 + $0x8] sm:$0xff]  ;;  %v18_v10 = vld [vmem:[%s504_s0 + $0x20] sm:$0xff]  ;;  %v21_v13 = vld [vmem:[%s504_s0 + $0x38] sm:$0xff] }
   0x5   :  { %v394_v9 = vpack.c.bf16 %v195_v8, %v194_v6  ;;  %v19_v11 = vld [vmem:[%s504_s0 + $0x28] sm:$0xff] }
   0x6   :  { %32 = vrot.lane.b32.xlu0 %v15_v2, %s399_s16  ;;  %36 = vrot.lane.b32.xlu1 %v17_v3, %s399_s16 }
   0x7   :  { %391 = vmatprep.subr.bf16.mxu0 %v390_v7  ;;  %395 = vmatprep.subr.bf16.mxu1 %v394_v9 }
   0x8   :  { %393 = vmatpush3.bf16.msra.mxu0 %v390_v7  ;;  %397 = vmatpush3.bf16.msra.mxu1 %v394_v9 }
   0xa   :  { %38 = vrot.lane.b32.xlu0 %v18_v10, %s399_s16  ;;  %40 = vrot.lane.b32.xlu1 %v19_v11, %s399_s16 }
   0xe   :  { %42 = vrot.lane.b32.xlu0 %v20_v12, %s399_s16  ;;  %44 = vrot.lane.b32.xlu1 %v21_v13, %s399_s16 }
  0x74   :  { %v31_v14 = vpop.permute.xlu0 %30  ;;  %v35_v15 = vpop.permute.xlu1 %34 }
  0x75   :  { %v54_v16 = vmax.f32 %v14_v0, %v31_v14  ;;  %v56_v17 = vmax.f32 %v16_v1, %v35_v15 }
  0x77   :  { %362 = vmatprep.mubr.msk.f32.mxu0 %vm64_vm0, %v54_v16  ;;  %378 = vmatprep.mubr.msk.f32.mxu1 %vm64_vm0, %v54_v16 }
  0x78   :  { %v33_v18 = vpop.permute.xlu0 %32  ;;  %v37_v19 = vpop.permute.xlu1 %36 }
  0x79   :  { %v55_v20 = vmax.f32 %v15_v2, %v33_v18  ;;  %v57_v21 = vmax.f32 %v17_v3, %v37_v19 }
  0x7b   :  { %363 = vmatmul.mubr.msk.f32.vlgmr.msra.gmra.mrb[0].mxu0 %vm64_vm0, %v55_v20  ;;  %379 = vmatmul.mubr.msk.f32.vlgmr.msra.gmra.mrb[0].mxu1 %vm64_vm0, %v55_v20 }
  0x7c   :  { %365 = vmatprep.mubr.msk.f32.mxu0 %vm64_vm0, %v56_v17  ;;  %381 = vmatprep.mubr.msk.f32.mxu1 %vm64_vm0, %v56_v17  ;;  %v39_v22 = vpop.permute.xlu0 %38  ;;  %v41_v23 = vpop.permute.xlu1 %40 }
  0x7d   :  { %v58_v24 = vmax.f32 %v18_v10, %v39_v22  ;;  %v59_v25 = vmax.f32 %v19_v11, %v41_v23 }
  0x7f   :  { %366 = vmatmul.mubr.msk.f32.gmra.mrb[2].mxu0 %vm64_vm0, %v57_v21  ;;  %382 = vmatmul.mubr.msk.f32.gmra.mrb[2].mxu1 %vm64_vm0, %v57_v21 }
  0x80   :  { %368 = vmatprep.mubr.msk.f32.mxu0 %vm64_vm0, %v58_v24  ;;  %384 = vmatprep.mubr.msk.f32.mxu1 %vm64_vm0, %v58_v24  ;;  %v43_v26 = vpop.permute.xlu0 %42  ;;  %v45_v27 = vpop.permute.xlu1 %44 }
  0x81   :  { %v60_v28 = vmax.f32 %v20_v12, %v43_v26  ;;  %v61_v29 = vmax.f32 %v21_v13, %v45_v27 }
  0x83   :  { %369 = vmatmul.mubr.msk.f32.gmra.mrb[4].mxu0 %vm64_vm0, %v59_v25  ;;  %385 = vmatmul.mubr.msk.f32.gmra.mrb[4].mxu1 %vm64_vm0, %v59_v25 }
  0x84   :  { %371 = vmatprep.mubr.msk.f32.mxu0 %vm64_vm0, %v60_v28  ;;  %387 = vmatprep.mubr.msk.f32.mxu1 %vm64_vm0, %v60_v28 }
  0x87   :  { %372 = vmatmul.mubr.msk.f32.gmra.mrb[6].mxu0 %vm64_vm0, %v61_v29  ;;  %388 = vmatmul.mubr.msk.f32.gmra.mrb[6].mxu1 %vm64_vm0, %v61_v29 }
 0x14e   :  { %v364_v30 = vpop.f32.mrb[0].mxu0  ;;  %v380_v31 = vpop.f32.mrb[0].mxu1 }
 0x14f   :  { %v302_v32 = vmax.f32 %v364_v30, %v380_v31  ;;  %v155_v33 = vpop.f32.mrb[1].mxu0  ;;  %v262_v34 = vpop.f32.mrb[1].mxu1 }
 0x150   :  { %v301_v35 = vmax.f32 %v155_v33, %v262_v34 }
 0x151   :  { %311 = vst.msk [vmem:[%s507_s3 + $0x8] sm:$0xff] %vm309_vm1, %v302_v32 }
 0x152   :  { %310 = vst.msk [vmem:[%s507_s3] sm:$0xff] %vm309_vm1, %v301_v35  ;;  %v367_v36 = vpop.f32.mrb[2].mxu0  ;;  %v383_v37 = vpop.f32.mrb[2].mxu1 }
 0x153   :  { %v304_v38 = vmax.f32 %v367_v36, %v383_v37  ;;  %v165_v39 = vpop.f32.mrb[3].mxu0  ;;  %v272_v40 = vpop.f32.mrb[3].mxu1 }
 0x154   :  { %v303_v41 = vmax.f32 %v165_v39, %v272_v40 }
 0x155   :  { %313 = vst.msk [vmem:[%s507_s3 + $0x18] sm:$0xff] %vm309_vm1, %v304_v38 }
 0x156   :  { %312 = vst.msk [vmem:[%s507_s3 + $0x10] sm:$0xff] %vm309_vm1, %v303_v41  ;;  %v370_v42 = vpop.f32.mrb[4].mxu0  ;;  %v386_v43 = vpop.f32.mrb[4].mxu1 }
 0x157   :  { %v306_v44 = vmax.f32 %v370_v42, %v386_v43  ;;  %v175_v45 = vpop.f32.mrb[5].mxu0  ;;  %v282_v46 = vpop.f32.mrb[5].mxu1 }
 0x158   :  { %v305_v47 = vmax.f32 %v175_v45, %v282_v46 }
 0x159   :  { %315 = vst.msk [vmem:[%s507_s3 + $0x28] sm:$0xff] %vm309_vm1, %v306_v44 }
 0x15a   :  { %314 = vst.msk [vmem:[%s507_s3 + $0x20] sm:$0xff] %vm309_vm1, %v305_v47  ;;  %v373_v48 = vpop.f32.mrb[6].mxu0  ;;  %v389_v49 = vpop.f32.mrb[6].mxu1 }
 0x15b   :  { %v308_v50 = vmax.f32 %v373_v48, %v389_v49  ;;  %v185_v51 = vpop.f32.mrb[7].mxu0  ;;  %v292_v52 = vpop.f32.mrb[7].mxu1 }
 0x15c   :  { %v307_v53 = vmax.f32 %v185_v51, %v292_v52 }
 0x15d   :  { %317 = vst.msk [vmem:[%s507_s3 + $0x38] sm:$0xff] %vm309_vm1, %v308_v50 }
 0x15e   :  { %316 = vst.msk [vmem:[%s507_s3 + $0x30] sm:$0xff] %vm309_vm1, %v307_v53 }

</bundles_post_ra>
